<compile_context>
chip_gen: v6e
topology: v6e:2x2x1
jax: 0.10.0
libtpu: 0.0.40
codegen_flags: <defaults>
</compile_context>

<pallas_src>
import functools

import jax
import jax.numpy as jnp
import numpy as np
from jax.experimental import pallas as pl
from jax.experimental.pallas import tpu as pltpu


_MASK_VALUE = -1e30  # finite "minus infinity" for padded key columns


def _round_up(v, m):
    return ((v + m - 1) // m) * m


def _cdiv(a, b):
    return (a + b - 1) // b


def _vmem_cap_bytes():
    """Physical VMEM of the local chip (v5e/v6e: 128 MiB, v7x: 64 MiB per TC)."""
    try:
        return int(pltpu.get_tpu_info().vmem_capacity_bytes)
    except Exception:
        return 64 * 1024 * 1024  # conservative (v7x-sized) fallback


def _stage1_vmem_bytes(tn, C, C8, x_bytes, p_bytes):
    return (2 * tn * C * x_bytes                    # x row tile (double-buffered)
            + 2 * C * C8 * x_bytes + 4 * C8 * 4     # resident weights + biases
            + 2 * 2 * tn * C8 * p_bytes             # f and gT output tiles
            + 2 * tn * C8 * 4)                      # f32 results before the cast


def _stage2_vmem_bytes(tn, C8, D, p_bytes, t_bytes, kvb):
    return (2 * tn * C8 * p_bytes                   # f (query) tile
            + kvb * C8 * tn * p_bytes               # gT (key) tile, kvb-deep
            + kvb * tn * D * t_bytes                # t value tile, kvb-deep
            + 2 * tn * D * t_bytes                  # t residual tile
            + 2 * tn * D * t_bytes                  # output tile
            + tn * D * 4 + 2 * tn * 4               # acc / m / l scratch
            + 2 * tn * tn * 4)                      # score + prob f32 temporaries


# ---------------------------------------------------------------------------
# Stage 1: f (row-major) and g^T (lane-dense) projections of the 1x1 convs
# ---------------------------------------------------------------------------
def _proj_kernel(x_ref, wf_ref, wgt_ref, bf_ref, bgt_ref, f_ref, gt_ref):
    # x_ref:   (tr, C)   channels-last row tile
    # wf_ref:  (C, C8)   f weight (in, out)
    # wgt_ref: (C8, C)   g weight pre-transposed (out, in)
    # bf_ref:  (1, C8)   f bias
    # bgt_ref: (C8, 1)   g bias (column vector)
    # f_ref:   (tr, C8)  f output tile (row-major)
    # gt_ref:  (C8, tr)  g output tile (transposed -> lane-dense)
    x = x_ref[...]
    f = jnp.dot(x, wf_ref[...], preferred_element_type=jnp.float32) + bf_ref[...]
    # g^T computed directly with an NT (rhs-transposed) matmul: (C8, C) x (tr, C)^T
    gt = jax.lax.dot_general(
        wgt_ref[...], x,
        dimension_numbers=(((1,), (1,)), ((), ())),
        preferred_element_type=jnp.float32) + bgt_ref[...]
    f_ref[...] = f.astype(f_ref.dtype)
    gt_ref[...] = gt.astype(gt_ref.dtype)


# ---------------------------------------------------------------------------
# Stage 2: flash-style attention   out = gamma * softmax(f g^T) @ t + t
# ---------------------------------------------------------------------------
def _attn_kernel(gamma_ref, f_ref, gt_ref, tv_ref, tres_ref, o_ref,
                 m_sc, l_sc, acc_sc, *, n_valid, k_tile, need_mask, approx_recip):
    # gamma_ref: SMEM (1,)
    # f_ref:   (tq, C8)  query rows (tile qi)
    # gt_ref:  (C8, tk)  key rows, transposed / lane-dense (tile ki)
    # tv_ref:  (tk, D)   value rows (tile ki)
    # tres_ref:(tq, D)   residual rows (tile qi)
    # o_ref:   (tq, D)
    ki = pl.program_id(2)

    @pl.when(ki == 0)
    def _():
        m_sc[...] = jnp.full(m_sc.shape, -jnp.inf, m_sc.dtype)
        l_sc[...] = jnp.zeros(l_sc.shape, l_sc.dtype)
        acc_sc[...] = jnp.zeros(acc_sc.shape, acc_sc.dtype)

    # score block: plain NN matmul thanks to the transposed g layout
    s = jnp.dot(f_ref[...], gt_ref[...],
                preferred_element_type=jnp.float32)               # (tq, tk)

    if need_mask:  # static: only emitted when N was padded up to n_pad
        col = jax.lax.broadcasted_iota(jnp.int32, s.shape, 1) + ki * k_tile
        s = jnp.where(col < n_valid, s, _MASK_VALUE)

    m_prev = m_sc[...]
    m_new = jnp.maximum(m_prev, jnp.max(s, axis=-1, keepdims=True))
    alpha = jnp.exp(m_prev - m_new)                               # (tq, 1)
    p = jnp.exp(s - m_new)                                        # unnormalized probs
    l_sc[...] = alpha * l_sc[...] + jnp.sum(p, axis=-1, keepdims=True)
    acc_sc[...] = alpha * acc_sc[...] + jnp.dot(
        p.astype(tv_ref.dtype), tv_ref[...],
        preferred_element_type=jnp.float32)
    m_sc[...] = m_new

    @pl.when(ki == pl.num_programs(2) - 1)
    def _():
        # deferred softmax normalization folded into the gamma scale
        if approx_recip:
            inv_l = pl.reciprocal(l_sc[...], approx=True)         # EUP slot
        else:
            inv_l = 1.0 / l_sc[...]
        scale = gamma_ref[0] * inv_l                              # (tq, 1)
        o_ref[...] = (acc_sc[...] * scale
                      + tres_ref[...].astype(jnp.float32)).astype(o_ref.dtype)


def self_attention(x, t, wf, bf, wg, bg, gamma, *,
                   n_tile=512, proj_dtype=jnp.bfloat16,
                   kv_buffers=3, approx_reciprocal=True):
    """x: (B, C, W, H) NCHW; t: (B, N, D) with N = W*H.

    wf, wg: (C, C8) 1x1-conv weights stored (in, out); bf, bg: (1, C8);
    gamma: (1,).  Returns (B, N, D) = gamma * softmax(f^T g) @ t + t.
    """
    B, C, W, H = x.shape
    N = W * H
    C8 = wf.shape[1]
    D = t.shape[2]
    assert t.shape == (B, N, D)
    assert wf.shape == (C, C8) and wg.shape == (C, C8)

    x_dtype = x.dtype
    if proj_dtype is None:
        proj_dtype = x_dtype
    kv_buffers = max(2, int(kv_buffers))

    # ---- glue (plain JAX, cheap): layouts, weight prep, gamma/bias dtypes ----
    x_flat = jnp.transpose(x.reshape(B, C, N), (0, 2, 1)).astype(x_dtype)   # (B, N, C)
    wf_ = wf.astype(x_dtype)                                                # (C, C8)
    wgt = jnp.transpose(wg).astype(x_dtype)                                 # (C8, C)
    bf_ = jnp.asarray(bf, jnp.float32).reshape(1, C8)
    bgt = jnp.asarray(bg, jnp.float32).reshape(C8, 1)
    gamma = jnp.asarray(gamma, jnp.float32).reshape((1,))

    # ---- tile selection: VMEM-budget (per generation) and megacore aware ----
    cap = _vmem_cap_bytes()
    budget = min(int(cap * 0.65), 100 * 1024 * 1024)   # v7x ~41 MiB, v5e/v6e ~83 MiB
    xb = np.dtype(x_dtype).itemsize
    pb = np.dtype(proj_dtype).itemsize
    tb = np.dtype(t.dtype).itemsize

    n_aligned = _round_up(N, 128)
    tn = min(max(128, (int(n_tile) // 128) * 128), n_aligned)
    while tn > 128 and max(_stage1_vmem_bytes(tn, C, C8, xb, pb),
                           _stage2_vmem_bytes(tn, C8, D, pb, tb, kv_buffers)) > budget:
        tn = max(128, ((tn // 2) // 128) * 128)
    # v7x megacore: keep at least 2 units of parallel (b, qi) work when possible
    while tn > 128 and B * _cdiv(n_aligned, tn) < 2:
        tn = max(128, ((tn // 2) // 128) * 128)

    n_pad = _round_up(N, tn)
    est = max(_stage1_vmem_bytes(tn, C, C8, xb, pb),
              _stage2_vmem_bytes(tn, C8, D, pb, tb, kv_buffers))
    vmem_limit = int(min(cap, max(est + (16 << 20), 32 << 20)))

    if n_pad != N:
        x_flat = jnp.pad(x_flat, ((0, 0), (0, n_pad - N), (0, 0)))
        t_in = jnp.pad(t, ((0, 0), (0, n_pad - N), (0, 0)))
    else:
        t_in = t

    # ---- stage 1: f (row-major) and g^T (lane-dense) projections -----------
    f, gt = pl.pallas_call(
        _proj_kernel,
        out_shape=(jax.ShapeDtypeStruct((B, n_pad, C8), proj_dtype),
                   jax.ShapeDtypeStruct((B, C8, n_pad), proj_dtype)),
        grid_spec=pltpu.PrefetchScalarGridSpec(
            num_scalar_prefetch=0,
            grid=(B, n_pad // tn),
            in_specs=[
                pl.BlockSpec((None, tn, C), lambda b, r: (b, r, 0)),   # x rows
                pl.BlockSpec((C, C8), lambda b, r: (0, 0)),            # wf
                pl.BlockSpec((C8, C), lambda b, r: (0, 0)),            # wg^T
                pl.BlockSpec((1, C8), lambda b, r: (0, 0)),            # bf
                pl.BlockSpec((C8, 1), lambda b, r: (0, 0)),            # bg^T
            ],
            out_specs=(
                pl.BlockSpec((None, tn, C8), lambda b, r: (b, r, 0)),  # f
                pl.BlockSpec((None, C8, tn), lambda b, r: (b, 0, r)),  # g^T
            ),
        ),
        compiler_params=pltpu.CompilerParams(
            dimension_semantics=("parallel", "parallel"),
            vmem_limit_bytes=vmem_limit),
    )(x_flat, wf_, wgt, bf_, bgt)

    # ---- stage 2: flash-style attention + residual --------------------------
    kernel = functools.partial(
        _attn_kernel, n_valid=N, k_tile=tn,
        need_mask=(n_pad != N), approx_recip=approx_reciprocal)

    out = pl.pallas_call(
        kernel,
        out_shape=jax.ShapeDtypeStruct((B, n_pad, D), t.dtype),
        grid_spec=pltpu.PrefetchScalarGridSpec(
            num_scalar_prefetch=0,
            grid=(B, n_pad // tn, n_pad // tn),
            in_specs=[
                pl.BlockSpec(memory_space=pltpu.MemorySpace.SMEM),             # gamma
                pl.BlockSpec((None, tn, C8), lambda b, qi, ki: (b, qi, 0)),    # f  (q)
                pl.BlockSpec((None, C8, tn), lambda b, qi, ki: (b, 0, ki),
                             pipeline_mode=pl.Buffered(kv_buffers)),           # g^T (k)
                pl.BlockSpec((None, tn, D), lambda b, qi, ki: (b, ki, 0),
                             pipeline_mode=pl.Buffered(kv_buffers)),           # t values
                pl.BlockSpec((None, tn, D), lambda b, qi, ki: (b, qi, 0)),     # residual
            ],
            out_specs=pl.BlockSpec((None, tn, D), lambda b, qi, ki: (b, qi, 0)),
            scratch_shapes=[
                pltpu.VMEM((tn, 1), jnp.float32),   # running max
                pltpu.VMEM((tn, 1), jnp.float32),   # running sum
                pltpu.VMEM((tn, D), jnp.float32),   # output accumulator
            ],
        ),
        compiler_params=pltpu.CompilerParams(
            dimension_semantics=("parallel", "parallel", "arbitrary"),
            vmem_limit_bytes=vmem_limit),
    )(gamma, f, gt, t_in, t_in)

    return out if n_pad == N else out[:, :N, :]


def self_attention_ref(x, t, wf, bf, wg, bg, gamma):
    """Plain-JAX reference matching the PyTorch forward (full-precision matmuls)."""
    B, C, W, H = x.shape
    N = W * H
    hi = jax.lax.Precision.HIGHEST
    x_flat = jnp.transpose(x.reshape(B, C, N), (0, 2, 1))                    # (B, N, C)
    f = jnp.einsum("bnc,ck->bnk", x_flat, wf, precision=hi) + bf             # (B, N, C8)
    g = jnp.einsum("bnc,ck->bnk", x_flat, wg, precision=hi) + bg             # (B, N, C8)
    attn = jax.nn.softmax(jnp.einsum("bnk,bmk->bnm", f, g, precision=hi), axis=-1)
    out = jnp.einsum("bnm,bmd->bnd", attn, t, precision=hi)
    return gamma[0] * out + t


if __name__ == "__main__":
    def make_inputs(key, B, C, W, H, D):
        C8 = max(C // 8, 1)
        N = W * H
        k_x, k_t, k_wf, k_wg = jax.random.split(key, 4)
        x = jax.random.normal(k_x, (B, C, W, H), dtype=jnp.float32)
        t = jax.random.normal(k_t, (B, N, D), dtype=jnp.float32)
        bound = (6.0 / (C + C8)) ** 0.5                   # xavier_uniform of the 1x1 conv
        wf = jax.random.uniform(k_wf, (C, C8), minval=-bound, maxval=bound,
                                dtype=jnp.float32)
        wg = jax.random.uniform(k_wg, (C, C8), minval=-bound, maxval=bound,
                                dtype=jnp.float32)
        bf = jnp.zeros((1, C8), jnp.float32)              # conv bias zeroed per init_conv
        bg = jnp.zeros((1, C8), jnp.float32)
        return x, t, wf, bf, wg, bg

    B, C, W, H, D = 2, 16, 16, 16, 32                     # N = 256, C//8 = 2
    x, t, wf, bf, wg, bg = make_inputs(jax.random.PRNGKey(0), B, C, W, H, D)
    gamma0 = jnp.zeros((1,), jnp.float32)                 # module __init__ value
    gamma = jnp.array([0.37], jnp.float32)

    # 1) gamma == 0 (fresh module): output must equal the residual t.
    out = jax.block_until_ready(self_attention(x, t, wf, bf, wg, bg, gamma0))
    ref = self_attention_ref(x, t, wf, bf, wg, bg, gamma0)
    assert out.shape == (B, W * H, D)
    assert jnp.allclose(out, ref, atol=1e-6), "gamma=0 path mismatch"

    # 2) nonzero gamma, default fast path (bf16 f/g intermediates, approx recip).
    out = jax.block_until_ready(self_attention(x, t, wf, bf, wg, bg, gamma))
    ref = self_attention_ref(x, t, wf, bf, wg, bg, gamma)
    assert jnp.allclose(out, ref, atol=5e-2, rtol=5e-2), "bf16 fast path mismatch"

    # 3) f32 intermediates + exact reciprocal, forced 128 tile -> exercises the
    #    multi-key-tile online-softmax recurrence.
    out = jax.block_until_ready(
        self_attention(x, t, wf, bf, wg, bg, gamma, n_tile=128,
                       proj_dtype=jnp.float32, approx_reciprocal=False))
    assert jnp.allclose(out, ref, atol=1e-2, rtol=1e-2), "f32 multi-tile mismatch"

    # 4) Ragged N (W=H=10 -> N=100, not a multiple of 128) -> exercises the
    #    padding + in-kernel key-column masking path.
    x2, t2, wf2, bf2, wg2, bg2 = make_inputs(jax.random.PRNGKey(1), 2, 16, 10, 10, 32)
    out2 = jax.block_until_ready(
        self_attention(x2, t2, wf2, bf2, wg2, bg2, gamma,
                       proj_dtype=jnp.float32, approx_reciprocal=False))
    ref2 = self_attention_ref(x2, t2, wf2, bf2, wg2, bg2, gamma)
    assert out2.shape == ref2.shape
    assert jnp.allclose(out2, ref2, atol=1e-2, rtol=1e-2), "ragged-N path mismatch"

    print("KERNEL_OK")
</pallas_src>

<mosaic_0001>
module attributes {stable_mosaic.version = 11 : i64} {
  func.func @_proj_kernel(%arg0: i32, %arg1: i32, %arg2: memref<1x256x16xf32, #tpu.memory_space<vmem>>, %arg3: memref<16x2xf32, #tpu.memory_space<vmem>>, %arg4: memref<2x16xf32, #tpu.memory_space<vmem>>, %arg5: memref<1x2xf32, #tpu.memory_space<vmem>>, %arg6: memref<2x1xf32, #tpu.memory_space<vmem>>, %arg7: memref<1x256x2xbf16, #tpu.memory_space<vmem>>, %arg8: memref<1x2x256xbf16, #tpu.memory_space<vmem>>) attributes {dimension_semantics = [#tpu.dimension_semantics<parallel>, #tpu.dimension_semantics<parallel>], iteration_bounds = array<i64: 2, 1>, scalar_prefetch = 0 : i64, scratch_operands = 0 : i64, tpu.core_type = #tpu.core_type<tc>, window_params = [{transform_indices = @transform_0, window_bounds = array<i64: 1, 256, 16>}, {pipeline_mode = #tpu.pipeline_mode<synchronous>, transform_indices = @transform_1, window_bounds = array<i64: 16, 2>}, {pipeline_mode = #tpu.pipeline_mode<synchronous>, transform_indices = @transform_2, window_bounds = array<i64: 2, 16>}, {pipeline_mode = #tpu.pipeline_mode<synchronous>, transform_indices = @transform_3, window_bounds = array<i64: 1, 2>}, {pipeline_mode = #tpu.pipeline_mode<synchronous>, transform_indices = @transform_4, window_bounds = array<i64: 2, 1>}, {transform_indices = @transform_5, window_bounds = array<i64: 1, 256, 2>}, {transform_indices = @transform_6, window_bounds = array<i64: 1, 2, 256>}]} {
    %c0 = arith.constant 0 : index
    %c0_0 = arith.constant 0 : index
    %c0_1 = arith.constant 0 : index
    %0 = vector.load %arg2[%c0, %c0_0, %c0_1] : memref<1x256x16xf32, #tpu.memory_space<vmem>>, vector<1x256x16xf32>
    %1 = vector.shape_cast %0 : vector<1x256x16xf32> to vector<256x16xf32>
    %c0_2 = arith.constant 0 : index
    %c0_3 = arith.constant 0 : index
    %2 = vector.load %arg3[%c0_2, %c0_3] : memref<16x2xf32, #tpu.memory_space<vmem>>, vector<16x2xf32>
    %cst = arith.constant dense<0.000000e+00> : vector<256x2xf32>
    %3 = tpu.matmul %1, %2, %cst {dimension_numbers = #tpu.dot_dimension_numbers<[1], [0], [0], [1], [0, 0, 1, 1], [], []>} : vector<256x16xf32>, vector<16x2xf32>, vector<256x2xf32> -> vector<256x2xf32>
    %c0_4 = arith.constant 0 : index
    %c0_5 = arith.constant 0 : index
    %4 = vector.load %arg5[%c0_4, %c0_5] : memref<1x2xf32, #tpu.memory_space<vmem>>, vector<1x2xf32>
    %5 = vector.broadcast %4 : vector<1x2xf32> to vector<256x2xf32>
    %6 = arith.addf %3, %5 : vector<256x2xf32>
    %c0_6 = arith.constant 0 : index
    %c0_7 = arith.constant 0 : index
    %7 = vector.load %arg4[%c0_6, %c0_7] : memref<2x16xf32, #tpu.memory_space<vmem>>, vector<2x16xf32>
    %cst_8 = arith.constant dense<0.000000e+00> : vector<2x256xf32>
    %8 = tpu.matmul %7, %1, %cst_8 {dimension_numbers = #tpu.dot_dimension_numbers<[1], [1], [0], [0], [0, 0, 1, 0], [], []>} : vector<2x16xf32>, vector<256x16xf32>, vector<2x256xf32> -> vector<2x256xf32>
    %c0_9 = arith.constant 0 : index
    %c0_10 = arith.constant 0 : index
    %9 = vector.load %arg6[%c0_9, %c0_10] : memref<2x1xf32, #tpu.memory_space<vmem>>, vector<2x1xf32>
    %10 = vector.broadcast %9 : vector<2x1xf32> to vector<2x256xf32>
    %11 = arith.addf %8, %10 : vector<2x256xf32>
    %12 = arith.truncf %6 : vector<256x2xf32> to vector<256x2xbf16>
    %c0_11 = arith.constant 0 : index
    %c0_12 = arith.constant 0 : index
    %c0_13 = arith.constant 0 : index
    %13 = vector.load %arg7[%c0_11, %c0_12, %c0_13] : memref<1x256x2xbf16, #tpu.memory_space<vmem>>, vector<1x256x2xbf16>
    %14 = vector.shape_cast %13 : vector<1x256x2xbf16> to vector<256x2xbf16>
    %15 = vector.shape_cast %12 : vector<256x2xbf16> to vector<1x256x2xbf16>
    tpu.vector_store %arg7[%c0_11, %c0_12, %c0_13], %15 {strides = array<i32>} : memref<1x256x2xbf16, #tpu.memory_space<vmem>>, vector<1x256x2xbf16>,
    %16 = arith.truncf %11 : vector<2x256xf32> to vector<2x256xbf16>
    %c0_14 = arith.constant 0 : index
    %c0_15 = arith.constant 0 : index
    %c0_16 = arith.constant 0 : index
    %17 = vector.load %arg8[%c0_14, %c0_15, %c0_16] : memref<1x2x256xbf16, #tpu.memory_space<vmem>>, vector<1x2x256xbf16>
    %18 = vector.shape_cast %17 : vector<1x2x256xbf16> to vector<2x256xbf16>
    %19 = vector.shape_cast %16 : vector<2x256xbf16> to vector<1x2x256xbf16>
    tpu.vector_store %arg8[%c0_14, %c0_15, %c0_16], %19 {strides = array<i32>} : memref<1x2x256xbf16, #tpu.memory_space<vmem>>, vector<1x2x256xbf16>,
    return
  }
  func.func @transform_0(%arg0: i32, %arg1: i32) -> (i32, i32, i32) {
    %c0_i32 = arith.constant 0 : i32
    %c0_i32_0 = arith.constant 0 : i32
    return %arg0, %arg1, %c0_i32 : i32, i32, i32
  }
  func.func @transform_1(%arg0: i32, %arg1: i32) -> (i32, i32) {
    %c0_i32 = arith.constant 0 : i32
    %c0_i32_0 = arith.constant 0 : i32
    %c0_i32_1 = arith.constant 0 : i32
    return %c0_i32, %c0_i32_0 : i32, i32
  }
  func.func @transform_2(%arg0: i32, %arg1: i32) -> (i32, i32) {
    %c0_i32 = arith.constant 0 : i32
    %c0_i32_0 = arith.constant 0 : i32
    %c0_i32_1 = arith.constant 0 : i32
    return %c0_i32, %c0_i32_0 : i32, i32
  }
  func.func @transform_3(%arg0: i32, %arg1: i32) -> (i32, i32) {
    %c0_i32 = arith.constant 0 : i32
    %c0_i32_0 = arith.constant 0 : i32
    %c0_i32_1 = arith.constant 0 : i32
    return %c0_i32, %c0_i32_0 : i32, i32
  }
  func.func @transform_4(%arg0: i32, %arg1: i32) -> (i32, i32) {
    %c0_i32 = arith.constant 0 : i32
    %c0_i32_0 = arith.constant 0 : i32
    %c0_i32_1 = arith.constant 0 : i32
    return %c0_i32, %c0_i32_0 : i32, i32
  }
  func.func @transform_5(%arg0: i32, %arg1: i32) -> (i32, i32, i32) {
    %c0_i32 = arith.constant 0 : i32
    %c0_i32_0 = arith.constant 0 : i32
    return %arg0, %arg1, %c0_i32 : i32, i32, i32
  }
  func.func @transform_6(%arg0: i32, %arg1: i32) -> (i32, i32, i32) {
    %c0_i32 = arith.constant 0 : i32
    %c0_i32_0 = arith.constant 0 : i32
    return %arg0, %c0_i32, %arg1 : i32, i32, i32
  }
}

</mosaic_0001>

<bundles_post_ra>
// kernel: tpu_custom_call.1
= control target key start
LH: loop header
LB: loop body
LE: loop exit
PB: predicated region body
PF: predicated region fallthrough
CT: control target
= control target key end

     0   :  { %12 = vsyncpa [#allocation3], 0  ;;  %s1883_s0 = inlined_call_operand.vmem [shape: f32[2,256,16], index: 0, kind: input, shape index: {}]   ;;  %s1884_s1 = inlined_call_operand.vmem [shape: f32[16,2], index: 1, kind: input, shape index: {}]   ;;  %s1885_s2 = inlined_call_operand.vmem [shape: f32[2,16], index: 2, kind: input, shape index: {}]   ;;  %s1886_s3 = inlined_call_operand.vmem [shape: f32[1,2], index: 3, kind: input, shape index: {}]   ;;  %s1887_s4 = inlined_call_operand.vmem [shape: f32[2,1], index: 4, kind: input, shape index: {}]   ;;  %s1888_s5 = inlined_call_operand.vmem [shape: bf16[2,256,2], index: 5, kind: output, shape index: {0}]   ;;  %s1889_s6 = inlined_call_operand.hbm [shape: bf16[2,2,256], index: 6, kind: output, shape index: {1}]  }
   0x1   :  { %14 = vsyncpa [#allocation3 + $0x1], 0  ;;  %s1518_s21 = smov 0   ;;  %s1520_s22 = smov 0  }
   0x2   :  { %s1522_s23 = smov 0   ;;  %s1524_s24 = smov 0  }
   0x3   :  { %s1526_s25 = smov 0   ;;  %s1528_s26 = smov 0  }
   0x4 LB: > { %s1074_s27 = sadd.s32 4294967295, %s1478_s26   ;;  %s1075_s28 = sadd.s32 4294967294, %s1478_s26   ;;  %s1478_s26 = sphi %s1528_s26, %s20_s26   ;;  %s1474_s25 = sphi %s1526_s25, %s1896_s25   ;;  %s1470_s24 = sphi %s1524_s24, %s1895_s24   ;;  %s1466_s23 = sphi %s1522_s23, %s1894_s23   ;;  %s1462_s22 = sphi %s1520_s22, %s1893_s22   ;;  %s1458_s21 = sphi %s1518_s21, %s1892_s21  }
   0x5   : > { %s32_s29 = sadd.s32 1, %s1474_s25  ;;  %s181_s30 = sadd.s32 1, %s1466_s23 }
   0x6   : > { %p34_p0 = scmp.ge.s32.totalorder %s32_s29, 2  ;;  %p191_p1 = scmp.ne.s32.totalorder %s1466_s23, %s1462_s22 }
   0x7   : > { %p192_p2 = scmp.eq.s32.totalorder %s1074_s27, 1  ;;  %p197_p3 = scmp.ne.s32.totalorder %s1462_s22, %s1458_s21 }
   0x8   : > { %s1898_s29 = smov (%p34_p0, %s32_s29), 0  ;;  %p198_p5 = scmp.eq.s32.totalorder %s1075_s28, 1 }
   0x9   : > { %p1558_p4 = por %p192_p2, %p191_p1  ;;  %s176_s8 = ssub.s32 %s1474_s25, %s1898_s29 }
   0xa   : > { %p1078_p6 = scmp.ge.s32.totalorder %s1478_s26, 1  ;;  %p179_p7 = scmp.eq.s32.totalorder %s176_s8, 0 }
   0xb   : > { %p1565_p8 = por %p198_p5, %p197_p3  ;;  %p241_p9 = scmp.lt.s32.totalorder %s1478_s26, 3 }
   0xc   : > { %s1571_s10 = scalar_select %p179_p7, %s1466_s23, %s181_s30  }
   0xd   : > { %p242_p10 = pnand %p1078_p6, %p241_p9 }
   0xe   : > { %p285_p11 = scmp.lt.s32.totalorder (!%p242_p10), %s1470_s24, 1  ;;  %s281_s16 = sand.u32 (!%p242_p10), 1, %s1462_s22  }
   0xf   : > { %245 = sbr.rel (%p242_p10) target bundleno = 303 (0x12f), region = 40  ;;  %s1079_s17 = sshll.u32 (!%p242_p10), %s281_s16, 1 }
  0x10   : > { %s1223_s18 = sshll.u32 (!%p242_p10), %s1470_s24, 5  ;;  %s941_s8 = scalar_lea.sflag (!%p242_p10), [#allocation3], %s281_s16 }
  0x14   : > { %vm346_vm0 = vcmask 130048   ;;  %v338_v0 = vld [vmem:[%s1884_s1 + $0x8] sm:$0xff]  ;;  %v337_v1 = vld [vmem:[%s1884_s1] sm:$0xff]  ;;  %s1591_s19 = scalar_select %p285_p11, %s1470_s24, 1  ;;  %v1480_v4 = vmov 0   ;;  %vm877_vm1 = vcmask 11264  }
  0x15   : > { %v1583_v2 = vld [vmem:[%s1885_s2] sm:$0x3]  ;;  %1292 = vmatprep.subr.mxu0 %v338_v0  ;;  %1401 = vset.pattern.permute.xlu0 %v1480_v4 }
  0x16   : > { %1290 = vmatprep.mubr.msk.f32.mxu1 %vm346_vm0, %v1583_v2  ;;  %v669_v3 = vld [vmem:[%s1887_s4] sm:$0x3]  ;;  %1293 = vmatpush3.msra.mxu0 %v338_v0  ;;  %s1189_s20 = sshll.u32 %s1591_s19, 8  ;;  %s1190_s12 = sshll.u32 %s1591_s19, 7 }
  0x17   : > { %1294 = vmatprep.subr.mxu0 %v337_v1  ;;  %672 = vperm.xlu0 %1401, %v669_v3   ;;  %s1597_s30 = scalar_lea.vmem %s1883_s0, %s1189_s20  ;;  %v1736_v37 = vld [vmem:[%s1886_s3] ss:$0 sm:$0xff]  ;;  %s1743_s15 = scalar_lea.vmem %s1888_s5, %s1190_s12 }
  0x18   : > { %1295 = vmatpush3.msra.mxu0 %v337_v1  ;;  %v1600_v5 = vld [vmem:[%s1597_s30 + $0xf8] sm:$0xff]  ;;  %v1604_v7 = vld [vmem:[%s1597_s30] sm:$0xff]  ;;  %v1611_v8 = vld [vmem:[%s1597_s30 + $0xf0] sm:$0xff]  ;;  %s283_s19 = scalar_lea.vmem [#allocation2], %s1079_s17  ;;  %s1482_s12 = smov [#allocation2]  }
  0x19   : > { %v320_v6 = vld [vmem:[%s1597_s30 + $0x78] sm:$0xff]  ;;  %1258 = vmatprep.subr.msk.mxu1 %vm346_vm0, %v1600_v5  ;;  %1296 = vmatprep.mubr.msk.f32.mxu0 %vm346_vm0, %v1604_v7  ;;  %v1614_v9 = vld [vmem:[%s1597_s30 + $0x8] sm:$0xff]  ;;  %v1620_v10 = vld [vmem:[%s1597_s30 + $0x10] sm:$0xff]  ;;  %s961_s20 = sshll.u32 %s283_s19, 4  ;;  %s1406_s13 = sshll.u32 %s1482_s12, 4  ;;  %s962_s20 = int_to_ptr.vmem [resolvable:$true] %s961_s20  ;;  %s1407_s13 = int_to_ptr.vmem [resolvable:$false] %s1406_s13 }
  0x1a   : > { %1259 = vmatpush3.xpose.msk.msra.mxu1 %vm346_vm0, %v320_v6  ;;  %1297 = vmatmul.mubr.msk.f32.vlgmr.msra.gmra.mxu0 %vm346_vm0, %v1614_v9  ;;  %v319_v11 = vld [vmem:[%s1597_s30 + $0x70] sm:$0xff]  ;;  %v1628_v12 = vld [vmem:[%s1597_s30 + $0x18] sm:$0xff]  ;;  %v1631_v13 = vld [vmem:[%s1597_s30 + $0xe8] sm:$0xff]  ;;  %s1402_s11 = scalar_lea.vmem %s962_s20, 32  ;;  %s1408_s24 = scalar_lea.vmem %s1407_s13, 64 }
  0x1b   : > { %1260 = vmatprep.subr.msk.mxu1 %vm346_vm0, %v1611_v8  ;;  %1299 = vmatprep.mubr.msk.f32.mxu0 %vm346_vm0, %v1620_v10  ;;  %v1634_v14 = vld [vmem:[%s1597_s30 + $0x20] sm:$0xff]  ;;  %v318_v15 = vld [vmem:[%s1597_s30 + $0x68] sm:$0xff]  ;;  %v311_v18 = vld [vmem:[%s1597_s30 + $0x30] sm:$0xff]  ;;  %p1403_p12 = scmp.ne.s32.totalorder %s962_s20, %s1402_s11  ;;  %p1409_p1 = scmp.lt.s32.totalorder %s962_s20, %s1407_s13 }
  0x1c   : > { %v310_v16 = vld [vmem:[%s1597_s30 + $0x28] sm:$0xff]  ;;  %v1646_v17 = vld [vmem:[%s1597_s30 + $0xe0] sm:$0xff]  ;;  %v312_v20 = vld [vmem:[%s1597_s30 + $0x38] sm:$0xff]  ;;  %p1410_p2 = scmp.lt.s32.totalorder %s1408_s24, %s1402_s11 }
  0x1d   : > { %v317_v19 = vld [vmem:[%s1597_s30 + $0x60] sm:$0xff]  ;;  %v332_v21 = vld [vmem:[%s1597_s30 + $0xd8] sm:$0xff]  ;;  %v314_v24 = vld [vmem:[%s1597_s30 + $0x48] sm:$0xff]  ;;  %p1404_p13 = pnand %p1403_p12, %p1558_p4 }
  0x1e   : > { %1261 = vmatpush3.xpose.msk.msra.mxu1 %vm346_vm0, %v319_v11  ;;  %1300 = vmatmul.mubr.msk.f32.gmra.mxu0 %vm346_vm0, %v1628_v12  ;;  %v313_v22 = vld [vmem:[%s1597_s30 + $0x40] sm:$0xff]  ;;  %v316_v23 = vld [vmem:[%s1597_s30 + $0x58] sm:$0xff]  ;;  %v331_v25 = vld [vmem:[%s1597_s30 + $0xd0] sm:$0xff]  ;;  %p1411_p3 = por %p1410_p2, %p1409_p1 }
  0x1f   : > { %1262 = vmatprep.subr.msk.mxu1 %vm346_vm0, %v1631_v13  ;;  %1302 = vmatprep.mubr.msk.f32.mxu0 %vm346_vm0, %v1634_v14  ;;  %v315_v26 = vld [vmem:[%s1597_s30 + $0x50] sm:$0xff]  ;;  %v330_v27 = vld [vmem:[%s1597_s30 + $0xc8] sm:$0xff]  ;;  %v329_v28 = vld [vmem:[%s1597_s30 + $0xc0] sm:$0xff]  ;;  %p1405_p0 = pneg %p1404_p13 }
  0x20   : > { %v328_v29 = vld [vmem:[%s1597_s30 + $0xb8] sm:$0xff]  ;;  %v321_v30 = vld [vmem:[%s1597_s30 + $0x80] sm:$0xff]  ;;  %v322_v31 = vld [vmem:[%s1597_s30 + $0x88] sm:$0xff] }
  0x21   : > { %v327_v32 = vld [vmem:[%s1597_s30 + $0xb0] sm:$0xff]  ;;  %v324_v34 = vld [vmem:[%s1597_s30 + $0x98] sm:$0xff]  ;;  %v326_v35 = vld [vmem:[%s1597_s30 + $0xa8] sm:$0xff]  ;;  %p1412_p5 = pnand %p1411_p3, %p1405_p0 }
  0x22   : > { %1263 = vmatpush3.xpose.msk.msra.mxu1 %vm346_vm0, %v318_v15  ;;  %1303 = vmatmul.mubr.msk.f32.gmra.mxu0 %vm346_vm0, %v310_v16  ;;  %v323_v33 = vld [vmem:[%s1597_s30 + $0x90] sm:$0xff]  ;;  %v325_v36 = vld [vmem:[%s1597_s30 + $0xa0] sm:$0xff]  ;;  %s959_s30 = scalar_lea.hbm %s1889_s6, %s1223_s18 }
  0x23   : > { %1264 = vmatprep.subr.msk.mxu1 %vm346_vm0, %v1646_v17  ;;  %1305 = vmatprep.mubr.msk.f32.mxu0 %vm346_vm0, %v311_v18 }
  0x26   : > { %1265 = vmatpush3.xpose.msk.msra.mxu1 %vm346_vm0, %v317_v19  ;;  %1306 = vmatmul.mubr.msk.f32.gmra.mxu0 %vm346_vm0, %v312_v20 }
  0x27   : > { %1266 = vmatprep.subr.msk.mxu1 %vm346_vm0, %v332_v21  ;;  %1308 = vmatprep.mubr.msk.f32.mxu0 %vm346_vm0, %v313_v22 }
  0x2a   : > { %1267 = vmatpush3.xpose.msk.msra.mxu1 %vm346_vm0, %v316_v23  ;;  %1309 = vmatmul.mubr.msk.f32.gmra.mxu0 %vm346_vm0, %v314_v24 }
  0x2b   : > { %1268 = vmatprep.subr.msk.mxu1 %vm346_vm0, %v331_v25  ;;  %1311 = vmatprep.mubr.msk.f32.mxu0 %vm346_vm0, %v315_v26 }
  0x2e   : > { %1269 = vmatpush3.xpose.msk.msra.mxu1 %vm346_vm0, %v315_v26  ;;  %1312 = vmatmul.mubr.msk.f32.gmra.mxu0 %vm346_vm0, %v316_v23 }
  0x2f   : > { %1270 = vmatprep.subr.msk.mxu1 %vm346_vm0, %v330_v27  ;;  %1314 = vmatprep.mubr.msk.f32.mxu0 %vm346_vm0, %v317_v19 }
  0x32   : > { %1271 = vmatpush3.xpose.msk.msra.mxu1 %vm346_vm0, %v314_v24  ;;  %1315 = vmatmul.mubr.msk.f32.gmra.mxu0 %vm346_vm0, %v318_v15 }
  0x33   : > { %1272 = vmatprep.subr.msk.mxu1 %vm346_vm0, %v329_v28  ;;  %1317 = vmatprep.mubr.msk.f32.mxu0 %vm346_vm0, %v319_v11 }
  0x36   : > { %1273 = vmatpush3.xpose.msk.msra.mxu1 %vm346_vm0, %v313_v22  ;;  %1318 = vmatmul.mubr.msk.f32.gmra.mxu0 %vm346_vm0, %v320_v6 }
  0x37   : > { %1274 = vmatprep.subr.msk.mxu1 %vm346_vm0, %v328_v29  ;;  %1320 = vmatprep.mubr.msk.f32.mxu0 %vm346_vm0, %v321_v30 }
  0x3a   : > { %1275 = vmatpush3.xpose.msk.msra.mxu1 %vm346_vm0, %v312_v20  ;;  %1321 = vmatmul.mubr.msk.f32.gmra.mxu0 %vm346_vm0, %v322_v31 }
  0x3b   : > { %1276 = vmatprep.subr.msk.mxu1 %vm346_vm0, %v327_v32  ;;  %1323 = vmatprep.mubr.msk.f32.mxu0 %vm346_vm0, %v323_v33 }
  0x3e   : > { %1277 = vmatpush3.xpose.msk.msra.mxu1 %vm346_vm0, %v311_v18  ;;  %1324 = vmatmul.mubr.msk.f32.gmra.mxu0 %vm346_vm0, %v324_v34 }
  0x3f   : > { %1278 = vmatprep.subr.msk.mxu1 %vm346_vm0, %v326_v35  ;;  %1326 = vmatprep.mubr.msk.f32.mxu0 %vm346_vm0, %v325_v36 }
  0x42   : > { %1279 = vmatpush3.xpose.msk.msra.mxu1 %vm346_vm0, %v310_v16  ;;  %1327 = vmatmul.mubr.msk.f32.gmra.mxu0 %vm346_vm0, %v326_v35 }
  0x43   : > { %1280 = vmatprep.subr.msk.mxu1 %vm346_vm0, %v325_v36  ;;  %1329 = vmatprep.mubr.msk.f32.mxu0 %vm346_vm0, %v327_v32 }
  0x46   : > { %1281 = vmatpush3.xpose.msk.msra.mxu1 %vm346_vm0, %v1634_v14  ;;  %1330 = vmatmul.mubr.msk.f32.gmra.mxu0 %vm346_vm0, %v328_v29 }
  0x47   : > { %1282 = vmatprep.subr.msk.mxu1 %vm346_vm0, %v324_v34  ;;  %1332 = vmatprep.mubr.msk.f32.mxu0 %vm346_vm0, %v329_v28 }
  0x4a   : > { %1283 = vmatpush3.xpose.msk.msra.mxu1 %vm346_vm0, %v1628_v12  ;;  %1333 = vmatmul.mubr.msk.f32.gmra.mxu0 %vm346_vm0, %v330_v27 }
  0x4b   : > { %1284 = vmatprep.subr.msk.mxu1 %vm346_vm0, %v323_v33  ;;  %1335 = vmatprep.mubr.msk.f32.mxu0 %vm346_vm0, %v331_v25 }
  0x4e   : > { %1285 = vmatpush3.xpose.msk.msra.mxu1 %vm346_vm0, %v1620_v10  ;;  %1336 = vmatmul.mubr.msk.f32.gmra.mxu0 %vm346_vm0, %v332_v21 }
  0x4f   : > { %1286 = vmatprep.subr.msk.mxu1 %vm346_vm0, %v322_v31  ;;  %1338 = vmatprep.mubr.msk.f32.mxu0 %vm346_vm0, %v1646_v17 }
  0x52   : > { %1287 = vmatpush3.xpose.msk.msra.mxu1 %vm346_vm0, %v1614_v9  ;;  %1339 = vmatmul.mubr.msk.f32.gmra.mxu0 %vm346_vm0, %v1631_v13 }
  0x53   : > { %1288 = vmatprep.subr.msk.mxu1 %vm346_vm0, %v321_v30  ;;  %1341 = vmatprep.mubr.msk.f32.mxu0 %vm346_vm0, %v1611_v8 }
  0x56   : > { %1289 = vmatpush3.xpose.msk.msra.mxu1 %vm346_vm0, %v1604_v7  ;;  %1342 = vmatmul.mubr.msk.f32.gmra.mxu0 %vm346_vm0, %v1600_v5 }
  0x59   : > { %1291 = vmatmul.mubr.msk.f32.vlgmr.msra.gmra.mxu1 %vm346_vm0, %v1583_v2 }
  0xda   : > { %v1298_v38 = vpop.f32.mrf.mxu0 }
  0xdb   : > { %v515_v39 = vadd.f32 %v1298_v38, %v1736_v37 }
  0xdc   : > { %v509_v40 = vpop.f32.mrf.mxu0 }
  0xdd   : > { %v1192_v41 = vpack.c.bf16 %v515_v39, %v515_v39  ;;  %v510_v42 = vadd.f32 %v1736_v37, %v509_v40 }
  0xde   : > { %v1301_v43 = vpop.f32.mrf.mxu0 }
  0xdf   : > { %879 = vst.msk [vmem:[%s1743_s15 + $0x4] sm:$0xf] %vm877_vm1, %v1192_v41  ;;  %v1191_v44 = vpack.c.bf16 %v510_v42, %v510_v42  ;;  %v525_v45 = vadd.f32 %v1301_v43, %v1736_v37 }
  0xe0   : > { %v519_v46 = vpop.f32.mrf.mxu0 }
  0xe1   : > { %878 = vst.msk [vmem:[%s1743_s15] sm:$0xf] %vm877_vm1, %v1191_v44  ;;  %v1194_v47 = vpack.c.bf16 %v525_v45, %v525_v45  ;;  %v520_v48 = vadd.f32 %v1736_v37, %v519_v46 }
  0xe2   : > { %v1304_v49 = vpop.f32.mrf.mxu0 }
  0xe3   : > { %881 = vst.msk [vmem:[%s1743_s15 + $0xc] sm:$0xf] %vm877_vm1, %v1194_v47  ;;  %v1193_v50 = vpack.c.bf16 %v520_v48, %v520_v48  ;;  %v535_v51 = vadd.f32 %v1304_v49, %v1736_v37 }
  0xe4   : > { %v529_v52 = vpop.f32.mrf.mxu0 }
  0xe5   : > { %880 = vst.msk [vmem:[%s1743_s15 + $0x8] sm:$0xf] %vm877_vm1, %v1193_v50  ;;  %v1196_v53 = vpack.c.bf16 %v535_v51, %v535_v51  ;;  %v530_v54 = vadd.f32 %v1736_v37, %v529_v52 }
  0xe6   : > { %v1307_v55 = vpop.f32.mrf.mxu0 }
  0xe7   : > { %883 = vst.msk [vmem:[%s1743_s15 + $0x14] sm:$0xf] %vm877_vm1, %v1196_v53  ;;  %v1195_v56 = vpack.c.bf16 %v530_v54, %v530_v54  ;;  %v545_v57 = vadd.f32 %v1307_v55, %v1736_v37 }
  0xe8   : > { %v539_v58 = vpop.f32.mrf.mxu0 }
  0xe9   : > { %882 = vst.msk [vmem:[%s1743_s15 + $0x10] sm:$0xf] %vm877_vm1, %v1195_v56  ;;  %v1198_v59 = vpack.c.bf16 %v545_v57, %v545_v57  ;;  %v540_v60 = vadd.f32 %v1736_v37, %v539_v58 }
  0xea   : > { %v1310_v61 = vpop.f32.mrf.mxu0 }
  0xeb   : > { %885 = vst.msk [vmem:[%s1743_s15 + $0x1c] sm:$0xf] %vm877_vm1, %v1198_v59  ;;  %v1197_v62 = vpack.c.bf16 %v540_v60, %v540_v60  ;;  %v555_v63 = vadd.f32 %v1310_v61, %v1736_v37 }
  0xec   : > { %v549_v0 = vpop.f32.mrf.mxu0 }
  0xed   : > { %884 = vst.msk [vmem:[%s1743_s15 + $0x18] sm:$0xf] %vm877_vm1, %v1197_v62  ;;  %v1200_v1 = vpack.c.bf16 %v555_v63, %v555_v63  ;;  %v550_v2 = vadd.f32 %v1736_v37, %v549_v0  ;;  %v1481_v62 = vmov 1966171168   ;;  %v918_v0 = vlaneseq }
  0xee   : > { %v1313_v3 = vpop.f32.mrf.mxu0  ;;  %v916_v63 = vunpack.c.l.s4 %v1481_v62 }
  0xef   : > { %887 = vst.msk [vmem:[%s1743_s15 + $0x24] sm:$0xf] %vm877_vm1, %v1200_v1  ;;  %v1199_v4 = vpack.c.bf16 %v550_v2, %v550_v2  ;;  %v565_v5 = vadd.f32 %v1313_v3, %v1736_v37 }
  0xf0   : > { %v559_v6 = vpop.f32.mrf.mxu0 }
  0xf1   : > { %886 = vst.msk [vmem:[%s1743_s15 + $0x20] sm:$0xf] %vm877_vm1, %v1199_v4  ;;  %v1202_v7 = vpack.c.bf16 %v565_v5, %v565_v5  ;;  %v560_v8 = vadd.f32 %v1736_v37, %v559_v6  ;;  %v917_v6 = vunpack.c.0.s8 %v916_v63 }
  0xf2   : > { %v1316_v9 = vpop.f32.mrf.mxu0 }
  0xf3   : > { %889 = vst.msk [vmem:[%s1743_s15 + $0x2c] sm:$0xf] %vm877_vm1, %v1202_v7  ;;  %v1201_v10 = vpack.c.bf16 %v560_v8, %v560_v8  ;;  %v575_v11 = vadd.f32 %v1316_v9, %v1736_v37  ;;  %v919_v7 = vshrl.u32 %v918_v0, 7  ;;  %v673_v9 = vpop.permute.xlu0 %672 }
  0xf4   : > { %v569_v12 = vpop.f32.mrf.mxu0 }
  0xf5   : > { %888 = vst.msk [vmem:[%s1743_s15 + $0x28] sm:$0xf] %vm877_vm1, %v1201_v10  ;;  %v1204_v13 = vpack.c.bf16 %v575_v11, %v575_v11  ;;  %v570_v14 = vadd.f32 %v1736_v37, %v569_v12 }
  0xf6   : > { %v1319_v15 = vpop.f32.mrf.mxu0 }
  0xf7   : > { %891 = vst.msk [vmem:[%s1743_s15 + $0x34] sm:$0xf] %vm877_vm1, %v1204_v13  ;;  %v1203_v16 = vpack.c.bf16 %v570_v14, %v570_v14  ;;  %v585_v17 = vadd.f32 %v1319_v15, %v1736_v37 }
  0xf8   : > { %v579_v18 = vpop.f32.mrf.mxu0 }
  0xf9   : > { %890 = vst.msk [vmem:[%s1743_s15 + $0x30] sm:$0xf] %vm877_vm1, %v1203_v16  ;;  %v1206_v19 = vpack.c.bf16 %v585_v17, %v585_v17  ;;  %v580_v20 = vadd.f32 %v1736_v37, %v579_v18  ;;  %v920_v17 = vsub.s32 %v917_v6, %v919_v7 }
  0xfa   : > { %v1322_v21 = vpop.f32.mrf.mxu0 }
  0xfb   : > { %893 = vst.msk [vmem:[%s1743_s15 + $0x3c] sm:$0xf] %vm877_vm1, %v1206_v19  ;;  %v1205_v22 = vpack.c.bf16 %v580_v20, %v580_v20  ;;  %v595_v23 = vadd.f32 %v1322_v21, %v1736_v37 }
  0xfc   : > { %v589_v24 = vpop.f32.mrf.mxu0 }
  0xfd   : > { %892 = vst.msk [vmem:[%s1743_s15 + $0x38] sm:$0xf] %vm877_vm1, %v1205_v22  ;;  %v1208_v25 = vpack.c.bf16 %v595_v23, %v595_v23  ;;  %v590_v26 = vadd.f32 %v1736_v37, %v589_v24 }
  0xfe   : > { %v1325_v27 = vpop.f32.mrf.mxu0 }
  0xff   : > { %895 = vst.msk [vmem:[%s1743_s15 + $0x44] sm:$0xf] %vm877_vm1, %v1208_v25  ;;  %v1207_v28 = vpack.c.bf16 %v590_v26, %v590_v26  ;;  %v605_v29 = vadd.f32 %v1325_v27, %v1736_v37 }
 0x100   : > { %v599_v30 = vpop.f32.mrf.mxu0 }
 0x101   : > { %894 = vst.msk [vmem:[%s1743_s15 + $0x40] sm:$0xf] %vm877_vm1, %v1207_v28  ;;  %v1210_v31 = vpack.c.bf16 %v605_v29, %v605_v29  ;;  %v600_v32 = vadd.f32 %v1736_v37, %v599_v30 }
 0x102   : > { %v1328_v33 = vpop.f32.mrf.mxu0 }
 0x103   : > { %897 = vst.msk [vmem:[%s1743_s15 + $0x4c] sm:$0xf] %vm877_vm1, %v1210_v31  ;;  %v1209_v34 = vpack.c.bf16 %v600_v32, %v600_v32  ;;  %v615_v35 = vadd.f32 %v1328_v33, %v1736_v37 }
 0x104   : > { %v609_v36 = vpop.f32.mrf.mxu0 }
 0x105   : > { %896 = vst.msk [vmem:[%s1743_s15 + $0x48] sm:$0xf] %vm877_vm1, %v1209_v34  ;;  %v1212_v38 = vpack.c.bf16 %v615_v35, %v615_v35  ;;  %v610_v39 = vadd.f32 %v1736_v37, %v609_v36 }
 0x106   : > { %v1331_v40 = vpop.f32.mrf.mxu0 }
 0x107   : > { %899 = vst.msk [vmem:[%s1743_s15 + $0x54] sm:$0xf] %vm877_vm1, %v1212_v38  ;;  %v1211_v41 = vpack.c.bf16 %v610_v39, %v610_v39  ;;  %v625_v42 = vadd.f32 %v1331_v40, %v1736_v37 }
 0x108   : > { %v619_v43 = vpop.f32.mrf.mxu0 }
 0x109   : > { %898 = vst.msk [vmem:[%s1743_s15 + $0x50] sm:$0xf] %vm877_vm1, %v1211_v41  ;;  %v1214_v44 = vpack.c.bf16 %v625_v42, %v625_v42  ;;  %v620_v45 = vadd.f32 %v1736_v37, %v619_v43 }
 0x10a   : > { %v1334_v46 = vpop.f32.mrf.mxu0 }
 0x10b   : > { %901 = vst.msk [vmem:[%s1743_s15 + $0x5c] sm:$0xf] %vm877_vm1, %v1214_v44  ;;  %v1213_v47 = vpack.c.bf16 %v620_v45, %v620_v45  ;;  %v635_v48 = vadd.f32 %v1334_v46, %v1736_v37 }
 0x10c   : > { %v629_v49 = vpop.f32.mrf.mxu0 }
 0x10d   : > { %900 = vst.msk [vmem:[%s1743_s15 + $0x58] sm:$0xf] %vm877_vm1, %v1213_v47  ;;  %v1216_v50 = vpack.c.bf16 %v635_v48, %v635_v48  ;;  %v630_v51 = vadd.f32 %v1736_v37, %v629_v49 }
 0x10e   : > { %v1337_v52 = vpop.f32.mrf.mxu0 }
 0x10f   : > { %903 = vst.msk [vmem:[%s1743_s15 + $0x64] sm:$0xf] %vm877_vm1, %v1216_v50  ;;  %v1215_v53 = vpack.c.bf16 %v630_v51, %v630_v51  ;;  %v645_v54 = vadd.f32 %v1337_v52, %v1736_v37 }
 0x110   : > { %v639_v55 = vpop.f32.mrf.mxu0 }
 0x111   : > { %902 = vst.msk [vmem:[%s1743_s15 + $0x60] sm:$0xf] %vm877_vm1, %v1215_v53  ;;  %v1218_v56 = vpack.c.bf16 %v645_v54, %v645_v54  ;;  %v640_v57 = vadd.f32 %v1736_v37, %v639_v55 }
 0x112   : > { %v1340_v58 = vpop.f32.mrf.mxu0 }
 0x113   : > { %905 = vst.msk [vmem:[%s1743_s15 + $0x6c] sm:$0xf] %vm877_vm1, %v1218_v56  ;;  %v1217_v59 = vpack.c.bf16 %v640_v57, %v640_v57  ;;  %v655_v60 = vadd.f32 %v1340_v58, %v1736_v37 }
 0x114   : > { %v649_v61 = vpop.f32.mrf.mxu0 }
 0x115   : > { %904 = vst.msk [vmem:[%s1743_s15 + $0x68] sm:$0xf] %vm877_vm1, %v1217_v59  ;;  %v1220_v1 = vpack.c.bf16 %v655_v60, %v655_v60  ;;  %v650_v2 = vadd.f32 %v1736_v37, %v649_v61 }
 0x116   : > { %v1343_v3 = vpop.f32.mrf.mxu0 }
 0x117   : > { %907 = vst.msk [vmem:[%s1743_s15 + $0x74] sm:$0xf] %vm877_vm1, %v1220_v1  ;;  %v1219_v4 = vpack.c.bf16 %v650_v2, %v650_v2  ;;  %v665_v5 = vadd.f32 %v1343_v3, %v1736_v37 }
 0x118   : > { %v659_v8 = vpop.f32.mrf.mxu0 }
 0x119   : > { %906 = vst.msk [vmem:[%s1743_s15 + $0x70] sm:$0xf] %vm877_vm1, %v1219_v4  ;;  %v744_v10 = vpop.f32.mrf.mxu1  ;;  %v1222_v11 = vpack.c.bf16 %v665_v5, %v665_v5  ;;  %v660_v12 = vadd.f32 %v1736_v37, %v659_v8 }
 0x11a   : > { %v745_v15 = vadd.f32 %v744_v10, %v673_v9 }
 0x11b   : > { %909 = vst.msk [vmem:[%s1743_s15 + $0x7c] sm:$0xf] %vm877_vm1, %v1222_v11  ;;  %v746_v13 = vpop.f32.mrf.mxu1  ;;  %v1221_v14 = vpack.c.bf16 %v660_v12, %v660_v12 }
 0x11c   : > { %v747_v16 = vadd.f32 %v746_v13, %v673_v9 }
 0x11d   : > { %908 = vst.msk [vmem:[%s1743_s15 + $0x78] sm:$0xf] %vm877_vm1, %v1221_v14 }
 0x11e   : > { %v1182_v18 = vpack.c.bf16 %v747_v16, %v745_v15 }
 0x120   : > { %v921_v19 = vrot.slane %v1182_v18, %v920_v17 }
 0x122   : > { %1183 = vst.sshfl [vmem:[%s283_s19] sm:$0x5 pattern:$0x73625140] %v921_v19 }
 0x123   : > { %1415 = shalt.err (!%p1412_p5)
}
 0x124   : > { %s1416_s14 = scalar_lea.hbm %s959_s30, 32  ;;  %s1420_s17 = scalar_lea.hbm %s1889_s6, 64 }
 0x125   : > { %p1417_p6 = scmp.ne.s32.totalorder %s959_s30, %s1416_s14  ;;  %p1421_p10 = scmp.lt.s32.totalorder %s959_s30, %s1889_s6 }
 0x126   : > { %p1422_p11 = scmp.lt.s32.totalorder %s1420_s17, %s1416_s14 }
 0x127   : > { %p1418_p7 = pnand %p1417_p6, %p1558_p4 }
 0x128   : > { %p1423_p12 = por %p1422_p11, %p1421_p10 }
 0x129   : > { %p1419_p9 = pneg %p1418_p7 }
 0x12b   : > { %p1424_p13 = pnand %p1423_p12, %p1419_p9 }
 0x12d   : > { %1427 = shalt.err (!%p1424_p13)
}
 0x12e   : > { %1344 = dma.vmem_to_hbm [thread:$0]  (%p1558_p4), %s962_s20, 32, %s959_s30, %s941_s8  }
 0x12f PF: > { %p1350_p0 = scmp.ge.s32.totalorder %s1478_s26, 2  ;;  %s985_s27 = sand.u32 1, %s1458_s21  }
 0x130   : > { %s986_s28 = scalar_lea.sflag [#allocation3], %s985_s27 }
 0x131   : > { %p1347_p1 = pnand %p1350_p0, %p1565_p8 }
 0x133   : > { %p1348_p2 = pneg %p1347_p1 }
 0x135   : > { %1453 = dma.done.wait (%p1348_p2), %s986_s28, 32  }
 0x136   : > { %1455 = vsyncadd (%p1348_p2), %s986_s28, 4294967264  ;;  %s20_s26 = sadd.s32 1, %s1478_s26   ;;  %s1892_s21 = smov %s1462_s22 }
 0x137   : > { %p17_p3 = scmp.ge.s32.totalorder %s20_s26, 4   ;;  %s1893_s22 = smov %s1466_s23 }
 0x138   : > { %s1894_s23 = smov %s1571_s10  ;;  %s1895_s24 = smov %s1474_s25 }
 0x139   : > { %s1896_s25 = smov %s1898_s29  ;;  %19 = sbr.rel (!%p17_p3) target bundleno = 4 (0x4), region = 87 }
 0x13e   :  { %991 = vsyncpa [#allocation3], 1 }
 0x13f   :  { %993 = vsyncpa [#allocation3 + $0x1], 1 }

</bundles_post_ra>
